<compile_context>
chip_gen: v5e
topology: v5e:2x2
jax: 0.10.0
libtpu: 0.0.40
codegen_flags: <defaults>
</compile_context>

<pallas_src>
import numpy as np
import jax
import jax.numpy as jnp
from jax.experimental import pallas as pl
from jax.experimental.pallas import tpu as pltpu

L0 = 300          # input length (x.view(-1, 1, 300))
L1 = 150          # after maxpool1 (k=3, s=2, p=1)
L2 = 75           # after maxpool2
L3 = 38           # after avgpool3
C3 = 2            # channels after conv3
C4 = 4            # channels after pointwise conv
FC_IN = C4 * L3   # 152
NUM_CLASSES = 5

BF16 = jnp.bfloat16


# ------------------------------ Pallas kernel ------------------------------ #

def model_kernel(x_ref, t1_ref, t2_ref, b2_ref, wbig_ref, bbig_ref,
                 wfc2_ref, bfc2_ref, out_ref):
    """One batch tile of the whole forward: 3 MXU matmuls + VPU pools + VPU fc2."""

    def mm(a, b_ref):
        # bf16 x bf16 MXU pass, f32 accumulation.
        return jnp.dot(a.astype(BF16), b_ref[...],
                       preferred_element_type=jnp.float32)

    def pool3(ye):
        # MaxPool1d(kernel=3, stride=1, padding=1) over a conv output.
        # `ye` is (tile, L+1): lane 0 is a replicated copy of the first conv
        # output (the replicate pad is built into the Toeplitz matrix), lanes
        # 1..L are the conv output, so the max of three shifted slices equals
        # the -inf-padded max pool on lanes 0..L-2.  The stride-2 selection of
        # the pool is folded into the NEXT matmul operand (odd lanes unused).
        # Pure value slices (no VMEM staging); compares stay f32 (v5e VALU).
        lout = ye.shape[-1] - 2
        return jnp.maximum(jnp.maximum(ye[:, 0:lout], ye[:, 1:lout + 1]),
                           ye[:, 2:lout + 2])

    x = x_ref[...]                                               # (tile, 300) f32
    m1 = pool3(mm(x, t1_ref))                                    # conv1 + maxpool1                -> (tile, 299)
    m2 = pool3(mm(m1, t2_ref) + b2_ref[...])                     # conv2 (+stride, +b1) + maxpool2 -> (tile, 149)
    h = jnp.maximum(mm(m2, wbig_ref) + bbig_ref[...], 0.0)       # conv3..fc1 folded, ReLU         -> (tile, 16)

    # fc2 on the VPU: rank-16 update into a lane-dense (tile, 128) output
    # (MXU is the bound unit; fc2 only used 16/256 rows of a weight tile).
    wfc2 = wfc2_ref[...]                                         # (16, 128) f32
    acc = jnp.broadcast_to(bfc2_ref[...], (h.shape[0], 128))
    for k in range(16):
        acc = acc + h[:, k:k + 1] * wfc2[k:k + 1, :]
    out_ref[...] = acc


# ------------------------- parameter / operand prep ------------------------ #

def init_params(seed=1234):
    rng = np.random.default_rng(seed)

    def u(shape, fan_in):
        bound = 1.0 / np.sqrt(fan_in)
        return rng.uniform(-bound, bound, size=shape).astype(np.float32)

    return {
        "w1":  u((1, 1, 15), 15),   "b1":  u((1,), 15),
        "w2":  u((1, 1, 17), 17),   "b2":  u((1,), 17),
        "w3":  u((2, 1, 19), 19),   "b3":  u((2,), 19),
        "wdw": u((2, 1, 21), 21),   "bdw": u((2,), 21),
        "wpw": u((4, 2, 1), 2),     "bpw": u((4,), 2),
        "wfc1": u((16, FC_IN), FC_IN), "bfc1": u((16,), FC_IN),
        "wfc2": u((5, 16), 16),        "bfc2": u((5,), 16),
    }


def build_kernel_operands(p):
    """Host-side (one-time) folding of every linear stage into 4 matrices."""
    f64 = np.float64

    def toeplitz(w, L, pad):
        # (x @ T)[l] = sum_k w[k] * x[l + k - pad]   (stride-1 conv)
        K = w.shape[0]
        Lout = L + 2 * pad - K + 1
        T = np.zeros((L, Lout), f64)
        for l in range(Lout):
            for k in range(K):
                j = l + k - pad
                if 0 <= j < L:
                    T[j, l] += float(w[k])
        return T

    def strided_toeplitz(w, L_full, pad):
        # conv1d(stride=1, padding=pad) applied to the stride-2 downsample
        # (even lanes) of a length-L_full stride-1-pooled signal.  Rows are
        # full-length lane indices (odd rows stay zero); the last (odd) row is
        # dropped so the matrix matches the (L_full-1)-wide pooled activation.
        K = w.shape[0]
        L_ds = (L_full - 1) // 2 + 1
        Lout = L_ds + 2 * pad - K + 1
        T = np.zeros((L_full - 1, Lout), f64)
        for l in range(Lout):
            for k in range(K):
                j = l + k - pad
                if 0 <= j < L_ds:
                    T[2 * j, l] += float(w[k])
        return T

    def avgpool_matrix(L):
        # AvgPool1d(k=3, s=2, p=1), count_include_pad=True -> divisor always 3
        Lout = (L - 1) // 2 + 1
        A = np.zeros((L, Lout), f64)
        for l in range(Lout):
            for off in (-1, 0, 1):
                j = 2 * l + off
                if 0 <= j < L:
                    A[j, l] = 1.0 / 3.0
        return A

    def rep_left(M):
        # Duplicate the first column: the replicated left-pad column of the
        # k=3/s=1 max pool is produced directly by the matmul feeding it.
        return np.concatenate([M[:, :1], M], axis=1)

    # conv1 (bias folded downstream), producing a left-replicated 301-wide row.
    T1e = rep_left(toeplitz(p["w1"][0, 0].astype(f64), L0, 7))            # (300, 301)

    # conv2 with maxpool1's stride-2 selection and conv1's bias folded in.
    T2s = strided_toeplitz(p["w2"][0, 0].astype(f64), L0, 8)              # (299, 150)
    bias2 = p["b1"][0] * np.ones((1, L0 - 1), f64) @ T2s + p["b2"][0]     # (1, 150)
    T2e, bias2e = rep_left(T2s), rep_left(bias2)                          # (299,151), (1,151)

    # conv3 . avgpool . depthwise . pointwise . flatten . fc1 -> one affine map.
    A3 = avgpool_matrix(L2)                                               # (75, 38)
    W1blk = np.ascontiguousarray(p["wfc1"].astype(f64).T).reshape(C4, L3, 16)
    Wbig = np.zeros((L1 - 1, 16), f64)
    bbig = p["bfc1"].astype(f64).reshape(1, 16).copy()
    for co in range(C4):
        bbig += p["bpw"][co] * np.ones((1, L3), f64) @ W1blk[co]
    for c in range(C3):
        T3s = strided_toeplitz(p["w3"][c, 0].astype(f64), L1, 9)          # (149, 75)
        Tdw = toeplitz(p["wdw"][c, 0].astype(f64), L3, 10)                # (38, 38)
        Wsum = sum(float(p["wpw"][co, c, 0]) * W1blk[co] for co in range(C4))  # (38, 16)
        Wbig += T3s @ A3 @ Tdw @ Wsum
        bbig += (p["b3"][c] * np.ones((1, L2), f64) @ A3 @ Tdw
                 + p["bdw"][c]) @ Wsum

    # fc2, zero-padded to a lane-dense 128-wide output (sliced back outside).
    Wfc2 = np.zeros((16, 128), f64)
    Wfc2[:, :NUM_CLASSES] = p["wfc2"].astype(f64).T
    bfc2 = np.zeros((1, 128), f64)
    bfc2[0, :NUM_CLASSES] = p["bfc2"]

    return dict(T1e=T1e, T2e=T2e, bias2e=bias2e, Wbig=Wbig, bbig=bbig,
                Wfc2=Wfc2, bfc2=bfc2)


# --------------------------------- wrapper --------------------------------- #

def _round_up(n, m):
    return ((n + m - 1) // m) * m


def _pick_tile(B):
    # Megacore-aware tile: aim for >=4 grid steps (v7x splits the "parallel"
    # axis across 2 TensorCores), but let the tile grow up to 512 rows for
    # large batches so the ~0.35us per-grid-step overhead is amortized on
    # single-TC chips (v5e/v6e).  Always a multiple of 8 (f32 sublane tile).
    tb = _round_up(max(1, -(-B // 4)), 8)
    return int(min(max(tb, 8), 512))


def make_forward(params, batch_tile=None):
    """Fold operands once, upload once, return a jitted batched forward."""
    ops = build_kernel_operands(params)
    # MXU operands in bf16 (halve VMEM/HBM footprint; MXU runs bf16 anyway),
    # biases and the VPU-side fc2 matrix stay f32.
    w = {
        "T1e":    jnp.asarray(ops["T1e"], BF16),
        "T2e":    jnp.asarray(ops["T2e"], BF16),
        "bias2e": jnp.asarray(ops["bias2e"], jnp.float32),
        "Wbig":   jnp.asarray(ops["Wbig"], BF16),
        "bbig":   jnp.asarray(ops["bbig"], jnp.float32),
        "Wfc2":   jnp.asarray(ops["Wfc2"], jnp.float32),
        "bfc2":   jnp.asarray(ops["bfc2"], jnp.float32),
    }

    def _resident(a):
        # Weights stay VMEM-resident across all batch tiles (constant index_map).
        return pl.BlockSpec(a.shape, lambda i: (0, 0))

    def call(x2d):
        B = x2d.shape[0]
        if batch_tile is not None:
            tb = _round_up(min(batch_tile, _round_up(B, 8)), 8)
        else:
            tb = _pick_tile(B)
        bp = _round_up(B, tb)
        if bp != B:
            x2d = jnp.pad(x2d, ((0, bp - B), (0, 0)))

        out = pl.pallas_call(
            model_kernel,
            out_shape=jax.ShapeDtypeStruct((bp, 128), jnp.float32),
            grid=(bp // tb,),
            in_specs=[pl.BlockSpec((tb, L0), lambda i: (i, 0)),
                      _resident(w["T1e"]), _resident(w["T2e"]),
                      _resident(w["bias2e"]), _resident(w["Wbig"]),
                      _resident(w["bbig"]), _resident(w["Wfc2"]),
                      _resident(w["bfc2"])],
            out_specs=pl.BlockSpec((tb, 128), lambda i: (i, 0)),
            compiler_params=pltpu.CompilerParams(
                dimension_semantics=("parallel",)),
        )(x2d, w["T1e"], w["T2e"], w["bias2e"], w["Wbig"], w["bbig"],
          w["Wfc2"], w["bfc2"])
        return out[:B, :NUM_CLASSES]

    @jax.jit
    def forward(x):
        return call(jnp.asarray(x, jnp.float32).reshape(-1, L0))

    return forward


# ----------------------- independent numpy reference ----------------------- #

def np_conv1d(x, w, b, pad, groups=1):
    B, Cin, L = x.shape
    Cout, Cin_g, K = w.shape
    Lout = L + 2 * pad - K + 1
    xp = np.zeros((B, Cin, L + 2 * pad), np.float32)
    xp[:, :, pad:pad + L] = x
    out = np.zeros((B, Cout, Lout), np.float32)
    og = Cout // groups
    for co in range(Cout):
        g = co // og
        acc = np.full((B, Lout), b[co], np.float32)
        for ci in range(Cin_g):
            cin = g * Cin_g + ci
            for k in range(K):
                acc += w[co, ci, k] * xp[:, cin, k:k + Lout]
        out[:, co] = acc
    return out


def np_maxpool1d(x, k=3, s=2, p=1):
    B, C, L = x.shape
    Lout = (L + 2 * p - k) // s + 1
    xp = np.full((B, C, L + 2 * p), -np.inf, np.float32)
    xp[:, :, p:p + L] = x
    return np.stack([xp[:, :, l * s:l * s + k].max(axis=-1) for l in range(Lout)], axis=-1)


def np_avgpool1d(x, k=3, s=2, p=1):
    B, C, L = x.shape
    Lout = (L + 2 * p - k) // s + 1
    xp = np.zeros((B, C, L + 2 * p), np.float32)
    xp[:, :, p:p + L] = x
    return np.stack([xp[:, :, l * s:l * s + k].mean(axis=-1) for l in range(Lout)], axis=-1)


def reference_forward(x, p):
    x = np.asarray(x, np.float32).reshape(-1, 1, L0)
    y = np_conv1d(x, p["w1"], p["b1"], 7)
    y = np_maxpool1d(y)
    y = np_conv1d(y, p["w2"], p["b2"], 8)
    y = np_maxpool1d(y)
    y = np_conv1d(y, p["w3"], p["b3"], 9)
    y = np_avgpool1d(y)
    y = np_conv1d(y, p["wdw"], p["bdw"], 10, groups=C3)   # depthwise
    y = np_conv1d(y, p["wpw"], p["bpw"], 0)               # pointwise
    flat = y.reshape(y.shape[0], -1)
    h = np.maximum(flat @ p["wfc1"].T + p["bfc1"], 0.0)
    return h @ p["wfc2"].T + p["bfc2"]


# ---------------------------------- main ----------------------------------- #

if __name__ == "__main__":
    B = 2
    key = jax.random.PRNGKey(0)
    x = jax.random.normal(key, (B, 1, L0), dtype=jnp.float32)

    params = init_params()
    forward = make_forward(params)

    out = jax.block_until_ready(forward(x))
    assert out.shape == (B, NUM_CLASSES) and out.dtype == jnp.float32

    ref = reference_forward(np.asarray(x), params)
    np.testing.assert_allclose(np.asarray(out), ref, rtol=2e-2, atol=2e-2)
    print("KERNEL_OK")
</pallas_src>

<mosaic_0001>
module attributes {stable_mosaic.version = 11 : i64} {
  func.func @model_kernel(%arg0: i32, %arg1: memref<8x300xf32, #tpu.memory_space<vmem>>, %arg2: memref<300x301xbf16, #tpu.memory_space<vmem>>, %arg3: memref<299x151xbf16, #tpu.memory_space<vmem>>, %arg4: memref<1x151xf32, #tpu.memory_space<vmem>>, %arg5: memref<149x16xbf16, #tpu.memory_space<vmem>>, %arg6: memref<1x16xf32, #tpu.memory_space<vmem>>, %arg7: memref<16x128xf32, #tpu.memory_space<vmem>>, %arg8: memref<1x128xf32, #tpu.memory_space<vmem>>, %arg9: memref<8x128xf32, #tpu.memory_space<vmem>>) attributes {dimension_semantics = [#tpu.dimension_semantics<parallel>], iteration_bounds = array<i64: 1>, scalar_prefetch = 0 : i64, scratch_operands = 0 : i64, tpu.core_type = #tpu.core_type<tc>, window_params = [{transform_indices = @transform_0, window_bounds = array<i64: 8, 300>}, {pipeline_mode = #tpu.pipeline_mode<synchronous>, transform_indices = @transform_1, window_bounds = array<i64: 300, 301>}, {pipeline_mode = #tpu.pipeline_mode<synchronous>, transform_indices = @transform_2, window_bounds = array<i64: 299, 151>}, {pipeline_mode = #tpu.pipeline_mode<synchronous>, transform_indices = @transform_3, window_bounds = array<i64: 1, 151>}, {pipeline_mode = #tpu.pipeline_mode<synchronous>, transform_indices = @transform_4, window_bounds = array<i64: 149, 16>}, {pipeline_mode = #tpu.pipeline_mode<synchronous>, transform_indices = @transform_5, window_bounds = array<i64: 1, 16>}, {pipeline_mode = #tpu.pipeline_mode<synchronous>, transform_indices = @transform_6, window_bounds = array<i64: 16, 128>}, {pipeline_mode = #tpu.pipeline_mode<synchronous>, transform_indices = @transform_7, window_bounds = array<i64: 1, 128>}, {transform_indices = @transform_8, window_bounds = array<i64: 8, 128>}]} {
    %c0 = arith.constant 0 : index
    %c0_0 = arith.constant 0 : index
    %0 = vector.load %arg1[%c0, %c0_0] : memref<8x300xf32, #tpu.memory_space<vmem>>, vector<8x300xf32>
    %1 = arith.truncf %0 : vector<8x300xf32> to vector<8x300xbf16>
    %c0_1 = arith.constant 0 : index
    %c0_2 = arith.constant 0 : index
    %2 = vector.load %arg2[%c0_1, %c0_2] : memref<300x301xbf16, #tpu.memory_space<vmem>>, vector<300x301xbf16>
    %cst = arith.constant dense<0.000000e+00> : vector<8x301xf32>
    %3 = tpu.matmul %1, %2, %cst {dimension_numbers = #tpu.dot_dimension_numbers<[1], [0], [0], [1], [0, 0, 1, 1], [], []>} : vector<8x300xbf16>, vector<300x301xbf16>, vector<8x301xf32> -> vector<8x301xf32>
    %4 = vector.extract_strided_slice %3 {offsets = [0, 0], sizes = [8, 299], strides = [1, 1]} : vector<8x301xf32> to vector<8x299xf32>
    %5 = vector.extract_strided_slice %3 {offsets = [0, 1], sizes = [8, 299], strides = [1, 1]} : vector<8x301xf32> to vector<8x299xf32>
    %6 = arith.maximumf %4, %5 : vector<8x299xf32>
    %7 = vector.extract_strided_slice %3 {offsets = [0, 2], sizes = [8, 299], strides = [1, 1]} : vector<8x301xf32> to vector<8x299xf32>
    %8 = arith.maximumf %6, %7 : vector<8x299xf32>
    %9 = arith.truncf %8 : vector<8x299xf32> to vector<8x299xbf16>
    %c0_3 = arith.constant 0 : index
    %c0_4 = arith.constant 0 : index
    %10 = vector.load %arg3[%c0_3, %c0_4] : memref<299x151xbf16, #tpu.memory_space<vmem>>, vector<299x151xbf16>
    %cst_5 = arith.constant dense<0.000000e+00> : vector<8x151xf32>
    %11 = tpu.matmul %9, %10, %cst_5 {dimension_numbers = #tpu.dot_dimension_numbers<[1], [0], [0], [1], [0, 0, 1, 1], [], []>} : vector<8x299xbf16>, vector<299x151xbf16>, vector<8x151xf32> -> vector<8x151xf32>
    %c0_6 = arith.constant 0 : index
    %c0_7 = arith.constant 0 : index
    %12 = vector.load %arg4[%c0_6, %c0_7] : memref<1x151xf32, #tpu.memory_space<vmem>>, vector<1x151xf32>
    %13 = vector.broadcast %12 : vector<1x151xf32> to vector<8x151xf32>
    %14 = arith.addf %11, %13 : vector<8x151xf32>
    %15 = vector.extract_strided_slice %14 {offsets = [0, 0], sizes = [8, 149], strides = [1, 1]} : vector<8x151xf32> to vector<8x149xf32>
    %16 = vector.extract_strided_slice %14 {offsets = [0, 1], sizes = [8, 149], strides = [1, 1]} : vector<8x151xf32> to vector<8x149xf32>
    %17 = arith.maximumf %15, %16 : vector<8x149xf32>
    %18 = vector.extract_strided_slice %14 {offsets = [0, 2], sizes = [8, 149], strides = [1, 1]} : vector<8x151xf32> to vector<8x149xf32>
    %19 = arith.maximumf %17, %18 : vector<8x149xf32>
    %20 = arith.truncf %19 : vector<8x149xf32> to vector<8x149xbf16>
    %c0_8 = arith.constant 0 : index
    %c0_9 = arith.constant 0 : index
    %21 = vector.load %arg5[%c0_8, %c0_9] : memref<149x16xbf16, #tpu.memory_space<vmem>>, vector<149x16xbf16>
    %cst_10 = arith.constant dense<0.000000e+00> : vector<8x16xf32>
    %22 = tpu.matmul %20, %21, %cst_10 {dimension_numbers = #tpu.dot_dimension_numbers<[1], [0], [0], [1], [0, 0, 1, 1], [], []>} : vector<8x149xbf16>, vector<149x16xbf16>, vector<8x16xf32> -> vector<8x16xf32>
    %c0_11 = arith.constant 0 : index
    %c0_12 = arith.constant 0 : index
    %23 = vector.load %arg6[%c0_11, %c0_12] : memref<1x16xf32, #tpu.memory_space<vmem>>, vector<1x16xf32>
    %24 = vector.broadcast %23 : vector<1x16xf32> to vector<8x16xf32>
    %25 = arith.addf %22, %24 : vector<8x16xf32>
    %cst_13 = arith.constant 0.000000e+00 : f32
    %26 = vector.broadcast %cst_13 : f32 to vector<8x16xf32>
    %27 = arith.maximumf %25, %26 : vector<8x16xf32>
    %c0_14 = arith.constant 0 : index
    %c0_15 = arith.constant 0 : index
    %28 = vector.load %arg7[%c0_14, %c0_15] : memref<16x128xf32, #tpu.memory_space<vmem>>, vector<16x128xf32>
    %c0_16 = arith.constant 0 : index
    %c0_17 = arith.constant 0 : index
    %29 = vector.load %arg8[%c0_16, %c0_17] : memref<1x128xf32, #tpu.memory_space<vmem>>, vector<1x128xf32>
    %30 = vector.shape_cast %29 : vector<1x128xf32> to vector<1x128xf32>
    %31 = vector.broadcast %30 : vector<1x128xf32> to vector<8x128xf32>
    %32 = vector.extract_strided_slice %27 {offsets = [0, 0], sizes = [8, 1], strides = [1, 1]} : vector<8x16xf32> to vector<8x1xf32>
    %33 = vector.extract_strided_slice %28 {offsets = [0, 0], sizes = [1, 128], strides = [1, 1]} : vector<16x128xf32> to vector<1x128xf32>
    %34 = vector.broadcast %32 : vector<8x1xf32> to vector<8x128xf32>
    %35 = vector.broadcast %33 : vector<1x128xf32> to vector<8x128xf32>
    %36 = arith.mulf %34, %35 : vector<8x128xf32>
    %37 = arith.addf %31, %36 : vector<8x128xf32>
    %38 = vector.extract_strided_slice %27 {offsets = [0, 1], sizes = [8, 1], strides = [1, 1]} : vector<8x16xf32> to vector<8x1xf32>
    %39 = vector.extract_strided_slice %28 {offsets = [1, 0], sizes = [1, 128], strides = [1, 1]} : vector<16x128xf32> to vector<1x128xf32>
    %40 = vector.broadcast %38 : vector<8x1xf32> to vector<8x128xf32>
    %41 = vector.broadcast %39 : vector<1x128xf32> to vector<8x128xf32>
    %42 = arith.mulf %40, %41 : vector<8x128xf32>
    %43 = arith.addf %37, %42 : vector<8x128xf32>
    %44 = vector.extract_strided_slice %27 {offsets = [0, 2], sizes = [8, 1], strides = [1, 1]} : vector<8x16xf32> to vector<8x1xf32>
    %45 = vector.extract_strided_slice %28 {offsets = [2, 0], sizes = [1, 128], strides = [1, 1]} : vector<16x128xf32> to vector<1x128xf32>
    %46 = vector.broadcast %44 : vector<8x1xf32> to vector<8x128xf32>
    %47 = vector.broadcast %45 : vector<1x128xf32> to vector<8x128xf32>
    %48 = arith.mulf %46, %47 : vector<8x128xf32>
    %49 = arith.addf %43, %48 : vector<8x128xf32>
    %50 = vector.extract_strided_slice %27 {offsets = [0, 3], sizes = [8, 1], strides = [1, 1]} : vector<8x16xf32> to vector<8x1xf32>
    %51 = vector.extract_strided_slice %28 {offsets = [3, 0], sizes = [1, 128], strides = [1, 1]} : vector<16x128xf32> to vector<1x128xf32>
    %52 = vector.broadcast %50 : vector<8x1xf32> to vector<8x128xf32>
    %53 = vector.broadcast %51 : vector<1x128xf32> to vector<8x128xf32>
    %54 = arith.mulf %52, %53 : vector<8x128xf32>
    %55 = arith.addf %49, %54 : vector<8x128xf32>
    %56 = vector.extract_strided_slice %27 {offsets = [0, 4], sizes = [8, 1], strides = [1, 1]} : vector<8x16xf32> to vector<8x1xf32>
    %57 = vector.extract_strided_slice %28 {offsets = [4, 0], sizes = [1, 128], strides = [1, 1]} : vector<16x128xf32> to vector<1x128xf32>
    %58 = vector.broadcast %56 : vector<8x1xf32> to vector<8x128xf32>
    %59 = vector.broadcast %57 : vector<1x128xf32> to vector<8x128xf32>
    %60 = arith.mulf %58, %59 : vector<8x128xf32>
    %61 = arith.addf %55, %60 : vector<8x128xf32>
    %62 = vector.extract_strided_slice %27 {offsets = [0, 5], sizes = [8, 1], strides = [1, 1]} : vector<8x16xf32> to vector<8x1xf32>
    %63 = vector.extract_strided_slice %28 {offsets = [5, 0], sizes = [1, 128], strides = [1, 1]} : vector<16x128xf32> to vector<1x128xf32>
    %64 = vector.broadcast %62 : vector<8x1xf32> to vector<8x128xf32>
    %65 = vector.broadcast %63 : vector<1x128xf32> to vector<8x128xf32>
    %66 = arith.mulf %64, %65 : vector<8x128xf32>
    %67 = arith.addf %61, %66 : vector<8x128xf32>
    %68 = vector.extract_strided_slice %27 {offsets = [0, 6], sizes = [8, 1], strides = [1, 1]} : vector<8x16xf32> to vector<8x1xf32>
    %69 = vector.extract_strided_slice %28 {offsets = [6, 0], sizes = [1, 128], strides = [1, 1]} : vector<16x128xf32> to vector<1x128xf32>
    %70 = vector.broadcast %68 : vector<8x1xf32> to vector<8x128xf32>
    %71 = vector.broadcast %69 : vector<1x128xf32> to vector<8x128xf32>
    %72 = arith.mulf %70, %71 : vector<8x128xf32>
    %73 = arith.addf %67, %72 : vector<8x128xf32>
    %74 = vector.extract_strided_slice %27 {offsets = [0, 7], sizes = [8, 1], strides = [1, 1]} : vector<8x16xf32> to vector<8x1xf32>
    %75 = vector.extract_strided_slice %28 {offsets = [7, 0], sizes = [1, 128], strides = [1, 1]} : vector<16x128xf32> to vector<1x128xf32>
    %76 = vector.broadcast %74 : vector<8x1xf32> to vector<8x128xf32>
    %77 = vector.broadcast %75 : vector<1x128xf32> to vector<8x128xf32>
    %78 = arith.mulf %76, %77 : vector<8x128xf32>
    %79 = arith.addf %73, %78 : vector<8x128xf32>
    %80 = vector.extract_strided_slice %27 {offsets = [0, 8], sizes = [8, 1], strides = [1, 1]} : vector<8x16xf32> to vector<8x1xf32>
    %81 = vector.extract_strided_slice %28 {offsets = [8, 0], sizes = [1, 128], strides = [1, 1]} : vector<16x128xf32> to vector<1x128xf32>
    %82 = vector.broadcast %80 : vector<8x1xf32> to vector<8x128xf32>
    %83 = vector.broadcast %81 : vector<1x128xf32> to vector<8x128xf32>
    %84 = arith.mulf %82, %83 : vector<8x128xf32>
    %85 = arith.addf %79, %84 : vector<8x128xf32>
    %86 = vector.extract_strided_slice %27 {offsets = [0, 9], sizes = [8, 1], strides = [1, 1]} : vector<8x16xf32> to vector<8x1xf32>
    %87 = vector.extract_strided_slice %28 {offsets = [9, 0], sizes = [1, 128], strides = [1, 1]} : vector<16x128xf32> to vector<1x128xf32>
    %88 = vector.broadcast %86 : vector<8x1xf32> to vector<8x128xf32>
    %89 = vector.broadcast %87 : vector<1x128xf32> to vector<8x128xf32>
    %90 = arith.mulf %88, %89 : vector<8x128xf32>
    %91 = arith.addf %85, %90 : vector<8x128xf32>
    %92 = vector.extract_strided_slice %27 {offsets = [0, 10], sizes = [8, 1], strides = [1, 1]} : vector<8x16xf32> to vector<8x1xf32>
    %93 = vector.extract_strided_slice %28 {offsets = [10, 0], sizes = [1, 128], strides = [1, 1]} : vector<16x128xf32> to vector<1x128xf32>
    %94 = vector.broadcast %92 : vector<8x1xf32> to vector<8x128xf32>
    %95 = vector.broadcast %93 : vector<1x128xf32> to vector<8x128xf32>
    %96 = arith.mulf %94, %95 : vector<8x128xf32>
    %97 = arith.addf %91, %96 : vector<8x128xf32>
    %98 = vector.extract_strided_slice %27 {offsets = [0, 11], sizes = [8, 1], strides = [1, 1]} : vector<8x16xf32> to vector<8x1xf32>
    %99 = vector.extract_strided_slice %28 {offsets = [11, 0], sizes = [1, 128], strides = [1, 1]} : vector<16x128xf32> to vector<1x128xf32>
    %100 = vector.broadcast %98 : vector<8x1xf32> to vector<8x128xf32>
    %101 = vector.broadcast %99 : vector<1x128xf32> to vector<8x128xf32>
    %102 = arith.mulf %100, %101 : vector<8x128xf32>
    %103 = arith.addf %97, %102 : vector<8x128xf32>
    %104 = vector.extract_strided_slice %27 {offsets = [0, 12], sizes = [8, 1], strides = [1, 1]} : vector<8x16xf32> to vector<8x1xf32>
    %105 = vector.extract_strided_slice %28 {offsets = [12, 0], sizes = [1, 128], strides = [1, 1]} : vector<16x128xf32> to vector<1x128xf32>
    %106 = vector.broadcast %104 : vector<8x1xf32> to vector<8x128xf32>
    %107 = vector.broadcast %105 : vector<1x128xf32> to vector<8x128xf32>
    %108 = arith.mulf %106, %107 : vector<8x128xf32>
    %109 = arith.addf %103, %108 : vector<8x128xf32>
    %110 = vector.extract_strided_slice %27 {offsets = [0, 13], sizes = [8, 1], strides = [1, 1]} : vector<8x16xf32> to vector<8x1xf32>
    %111 = vector.extract_strided_slice %28 {offsets = [13, 0], sizes = [1, 128], strides = [1, 1]} : vector<16x128xf32> to vector<1x128xf32>
    %112 = vector.broadcast %110 : vector<8x1xf32> to vector<8x128xf32>
    %113 = vector.broadcast %111 : vector<1x128xf32> to vector<8x128xf32>
    %114 = arith.mulf %112, %113 : vector<8x128xf32>
    %115 = arith.addf %109, %114 : vector<8x128xf32>
    %116 = vector.extract_strided_slice %27 {offsets = [0, 14], sizes = [8, 1], strides = [1, 1]} : vector<8x16xf32> to vector<8x1xf32>
    %117 = vector.extract_strided_slice %28 {offsets = [14, 0], sizes = [1, 128], strides = [1, 1]} : vector<16x128xf32> to vector<1x128xf32>
    %118 = vector.broadcast %116 : vector<8x1xf32> to vector<8x128xf32>
    %119 = vector.broadcast %117 : vector<1x128xf32> to vector<8x128xf32>
    %120 = arith.mulf %118, %119 : vector<8x128xf32>
    %121 = arith.addf %115, %120 : vector<8x128xf32>
    %122 = vector.extract_strided_slice %27 {offsets = [0, 15], sizes = [8, 1], strides = [1, 1]} : vector<8x16xf32> to vector<8x1xf32>
    %123 = vector.extract_strided_slice %28 {offsets = [15, 0], sizes = [1, 128], strides = [1, 1]} : vector<16x128xf32> to vector<1x128xf32>
    %124 = vector.broadcast %122 : vector<8x1xf32> to vector<8x128xf32>
    %125 = vector.broadcast %123 : vector<1x128xf32> to vector<8x128xf32>
    %126 = arith.mulf %124, %125 : vector<8x128xf32>
    %127 = arith.addf %121, %126 : vector<8x128xf32>
    %c0_18 = arith.constant 0 : index
    %c0_19 = arith.constant 0 : index
    %128 = vector.load %arg9[%c0_18, %c0_19] : memref<8x128xf32, #tpu.memory_space<vmem>>, vector<8x128xf32>
    tpu.vector_store %arg9[%c0_18, %c0_19], %127 {strides = array<i32>} : memref<8x128xf32, #tpu.memory_space<vmem>>, vector<8x128xf32>,
    return
  }
  func.func @transform_0(%arg0: i32) -> (i32, i32) {
    %c0_i32 = arith.constant 0 : i32
    %c0_i32_0 = arith.constant 0 : i32
    return %arg0, %c0_i32 : i32, i32
  }
  func.func @transform_1(%arg0: i32) -> (i32, i32) {
    %c0_i32 = arith.constant 0 : i32
    %c0_i32_0 = arith.constant 0 : i32
    %c0_i32_1 = arith.constant 0 : i32
    return %c0_i32, %c0_i32_0 : i32, i32
  }
  func.func @transform_2(%arg0: i32) -> (i32, i32) {
    %c0_i32 = arith.constant 0 : i32
    %c0_i32_0 = arith.constant 0 : i32
    %c0_i32_1 = arith.constant 0 : i32
    return %c0_i32, %c0_i32_0 : i32, i32
  }
  func.func @transform_3(%arg0: i32) -> (i32, i32) {
    %c0_i32 = arith.constant 0 : i32
    %c0_i32_0 = arith.constant 0 : i32
    %c0_i32_1 = arith.constant 0 : i32
    return %c0_i32, %c0_i32_0 : i32, i32
  }
  func.func @transform_4(%arg0: i32) -> (i32, i32) {
    %c0_i32 = arith.constant 0 : i32
    %c0_i32_0 = arith.constant 0 : i32
    %c0_i32_1 = arith.constant 0 : i32
    return %c0_i32, %c0_i32_0 : i32, i32
  }
  func.func @transform_5(%arg0: i32) -> (i32, i32) {
    %c0_i32 = arith.constant 0 : i32
    %c0_i32_0 = arith.constant 0 : i32
    %c0_i32_1 = arith.constant 0 : i32
    return %c0_i32, %c0_i32_0 : i32, i32
  }
  func.func @transform_6(%arg0: i32) -> (i32, i32) {
    %c0_i32 = arith.constant 0 : i32
    %c0_i32_0 = arith.constant 0 : i32
    %c0_i32_1 = arith.constant 0 : i32
    return %c0_i32, %c0_i32_0 : i32, i32
  }
  func.func @transform_7(%arg0: i32) -> (i32, i32) {
    %c0_i32 = arith.constant 0 : i32
    %c0_i32_0 = arith.constant 0 : i32
    %c0_i32_1 = arith.constant 0 : i32
    return %c0_i32, %c0_i32_0 : i32, i32
  }
  func.func @transform_8(%arg0: i32) -> (i32, i32) {
    %c0_i32 = arith.constant 0 : i32
    %c0_i32_0 = arith.constant 0 : i32
    return %arg0, %c0_i32 : i32, i32
  }
}

</mosaic_0001>

<bundles_post_ra>
// kernel: forward.1
= control target key start
LH: loop header
LB: loop body
LE: loop exit
PB: predicated region body
PF: predicated region fallthrough
CT: control target
= control target key end

     0   :  { %13 = vsyncpa [#allocation3], 0  ;;  %s2046_s0 = inlined_call_operand.vmem [shape: f32[8,300], index: 0, kind: input, shape index: {}]   ;;  %s2047_s1 = inlined_call_operand.hbm [shape: bf16[300,301], index: 1, kind: input, shape index: {}]   ;;  %s2048_s2 = inlined_call_operand.hbm [shape: bf16[299,151], index: 2, kind: input, shape index: {}]   ;;  %s2049_s3 = inlined_call_operand.vmem [shape: f32[1,151], index: 3, kind: input, shape index: {}]   ;;  %s2050_s4 = inlined_call_operand.hbm [shape: bf16[149,16], index: 4, kind: input, shape index: {}]   ;;  %s2051_s5 = inlined_call_operand.vmem [shape: f32[1,16], index: 5, kind: input, shape index: {}]   ;;  %s2052_s6 = inlined_call_operand.vmem [shape: f32[16,128], index: 6, kind: input, shape index: {}]   ;;  %s2053_s7 = inlined_call_operand.vmem [shape: f32[1,128], index: 7, kind: input, shape index: {}]   ;;  %s2054_s8 = inlined_call_operand.vmem [shape: f32[8,128], index: 8, kind: output, shape index: {}]  }
   0x1   :  { %14 = vsyncpa [#allocation5], 0  ;;  %s34_s29 = sshll.u32 %s2048_s2, 4  ;;  %s1884_s30 = smov [#allocation4]   ;;  %s35_s29 = int_to_ptr.hbm [resolvable:$true] %s34_s29 }
   0x2   :  { %s36_s9 = sshll.u32 %s1884_s30, 4  ;;  %s21_s12 = sshll.u32 %s2047_s1, 4  ;;  %s37_s9 = int_to_ptr.vmem [resolvable:$true] %s36_s9  ;;  %s22_s12 = int_to_ptr.hbm [resolvable:$true] %s21_s12 }
   0x3   :  { %s1885_s13 = smov 128   ;;  %s1886_s14 = smov 8  }
   0x4   :  { %42 = dma.hbm_to_vmem [thread:$0]  %s35_s29, 4864, %s37_s9, [#allocation5], %s1885_s13, %s1885_s13, %s1886_s14  }
   0x5   :  { %s1887_s15 = smov [#allocation2]   ;;  %s1888_s17 = smov 192  }
   0x6   :  { %s23_s16 = sshll.u32 %s1887_s15, 4  ;;  %s1889_s18 = smov 12   ;;  %s24_s16 = int_to_ptr.vmem [resolvable:$true] %s23_s16 }
   0x7   :  { %29 = dma.hbm_to_vmem [thread:$0]  %s22_s12, 7296, %s24_s16, [#allocation3], %s1888_s17, %s1888_s17, %s1889_s18  }
   0x8   :  { %s49_s20 = sshll.u32 %s2050_s4, 4  ;;  %s1890_s21 = smov [#allocation6]   ;;  %s50_s20 = int_to_ptr.hbm [resolvable:$true] %s49_s20 }
   0x9   :  { %s51_s22 = sshll.u32 %s1890_s21, 4  ;;  %s1891_s23 = smov 64   ;;  %s52_s22 = int_to_ptr.vmem [resolvable:$true] %s51_s22 }
   0xa   :  { %s1892_s1 = smov 4  }
   0xb   :  { %57 = dma.hbm_to_vmem [thread:$0]  %s50_s20, 1216, %s52_s22, [#allocation5], %s1891_s23, %s1891_s23, %s1892_s1  }
   0xc   :  { %1880 = dma.done.wait [#allocation3], 7296  }
   0xd   :  { %1881 = vsyncadd [#allocation3], 4294960000 }
   0xe   :  { %1882 = dma.done.wait [#allocation5], 6080  }
   0xf   :  { %1883 = vsyncadd [#allocation5], 4294961216  ;;  %vm464_vm0 = vcmask 1045504   ;;  %v1434_v0 = vld [vmem:[#allocation2 + $0x1b0] sm:$0xf]  ;;  %vm460_vm1 = vcmask 359424  }
  0x10   :  { %v1693_v1 = vld [vmem:[#allocation2 + $0x1b8] sm:$0x30]  ;;  %v1302_v2 = vld [vmem:[#allocation2 + $0xa8] sm:$0xf]  ;;  %v1660_v4 = vld [vmem:[#allocation2 + $0xb0] sm:$0xf0] }
  0x11   :  { %v1435_v3 = vor.u32 %v1693_v1, %v1434_v0  ;;  %v1422_v5 = vld [vmem:[#allocation2 + $0x198] sm:$0xf]  ;;  %v1690_v6 = vld [vmem:[#allocation2 + $0x1a0] sm:$0xf0]  ;;  %v1303_v7 = vor.u32 %v1660_v4, %v1302_v2  ;;  %v1290_v8 = vld [vmem:[#allocation2 + $0x90] sm:$0xf] }
  0x12   :  { %v1657_v9 = vld [vmem:[#allocation2 + $0x98] sm:$0xf0]  ;;  %v1398_v10 = vld [vmem:[#allocation2 + $0x168] sm:$0xf]  ;;  %v1684_v12 = vld [vmem:[#allocation2 + $0x170] sm:$0xf0]  ;;  %v1423_v14 = vor.u32 %v1690_v6, %v1422_v5 }
  0x13   :  { %v466_v11 = vsel %vm464_vm0, %v1435_v3, 0  ;;  %v1410_v13 = vld [vmem:[#allocation2 + $0x180] sm:$0xf]  ;;  %474 = vmatpush.bf16.msra.mxu0 %v1303_v7  ;;  %v1291_v15 = vor.u32 %v1657_v9, %v1290_v8  ;;  %v1399_v16 = vor.u32 %v1684_v12, %v1398_v10  ;;  %v1687_v17 = vld [vmem:[#allocation2 + $0x188] sm:$0xf0]  ;;  %v79_v28 = vld [vmem:[%s2046_s0 + $0x10] sm:$0xff] }
  0x14   :  { %505 = vmatpush.bf16.msra.mxu3 %v466_v11  ;;  %v1278_v18 = vld [vmem:[#allocation2 + $0x78] sm:$0xf]  ;;  %v1654_v19 = vld [vmem:[#allocation2 + $0x80] sm:$0xf0]  ;;  %v1659_v20 = vld [vmem:[#allocation2 + $0xac] sm:$0xf]  ;;  %v1411_v29 = vor.u32 %v1687_v17, %v1410_v13  ;;  %v1970_v45 = vpack.c.bf16 %v79_v28, %v79_v28 }
  0x15   :  { %v1304_v21 = vld [vmem:[#allocation2 + $0xb4] sm:$0xf0]  ;;  %v1683_v22 = vld [vmem:[#allocation2 + $0x16c] sm:$0xf]  ;;  %487 = vmatpush.bf16.msra.mxu1 %v1399_v16  ;;  %v1386_v24 = vld [vmem:[#allocation2 + $0x150] sm:$0xf]  ;;  %v1279_v30 = vor.u32 %v1654_v19, %v1278_v18 }
  0x16   :  { %v1400_v23 = vld [vmem:[#allocation2 + $0x174] sm:$0xf0]  ;;  %v1681_v25 = vld [vmem:[#allocation2 + $0x158] sm:$0xf0]  ;;  %v1266_v31 = vld [vmem:[#allocation2 + $0x60] sm:$0xf]  ;;  %v1307_v34 = vor.u32 %v1659_v20, %v1304_v21 }
  0x17   :  { %v1403_v26 = vor.u32 %v1683_v22, %v1400_v23  ;;  %v1387_v27 = vor.u32 %v1681_v25, %v1386_v24  ;;  %475 = vmatpush.bf16.msra.mxu0 %v1291_v15  ;;  %v1680_v32 = vld [vmem:[#allocation2 + $0x154] sm:$0xf]  ;;  %v1388_v33 = vld [vmem:[#allocation2 + $0x15c] sm:$0xf0]  ;;  %v1651_v35 = vld [vmem:[#allocation2 + $0x68] sm:$0xf0] }
  0x18   :  { %506 = vmatpush.bf16.msra.mxu3 %v1423_v14  ;;  %v1391_v36 = vor.u32 %v1680_v32, %v1388_v33  ;;  %v1374_v37 = vld [vmem:[#allocation2 + $0x138] sm:$0xf]  ;;  %v1678_v38 = vld [vmem:[#allocation2 + $0x140] sm:$0xf0]  ;;  %v1656_v39 = vld [vmem:[#allocation2 + $0x94] sm:$0xf]  ;;  %v1267_v46 = vor.u32 %v1651_v35, %v1266_v31 }
  0x19   :  { %526 = vmatpush.bf16.msra.mxu2 %v1403_v26  ;;  %488 = vmatpush.bf16.msra.mxu1 %v1387_v27  ;;  %v1292_v40 = vld [vmem:[#allocation2 + $0x9c] sm:$0xf0]  ;;  %v1375_v41 = vor.u32 %v1678_v38, %v1374_v37  ;;  %v1677_v42 = vld [vmem:[#allocation2 + $0x13c] sm:$0xf]  ;;  %v1376_v43 = vld [vmem:[#allocation2 + $0x144] sm:$0xf0] }
  0x1a   :  { %v1362_v44 = vld [vmem:[#allocation2 + $0x120] sm:$0xf]  ;;  %v1675_v47 = vld [vmem:[#allocation2 + $0x128] sm:$0xf0]  ;;  %v1295_v48 = vor.u32 %v1656_v39, %v1292_v40  ;;  %v1254_v49 = vld [vmem:[#allocation2 + $0x48] sm:$0xf]  ;;  %v1379_v52 = vor.u32 %v1677_v42, %v1376_v43 }
  0x1b   :  { %476 = vmatpush.bf16.msra.mxu0 %v1279_v30  ;;  %v1648_v50 = vld [vmem:[#allocation2 + $0x50] sm:$0xf0]  ;;  %v1653_v51 = vld [vmem:[#allocation2 + $0x7c] sm:$0xf]  ;;  %v1280_v53 = vld [vmem:[#allocation2 + $0x84] sm:$0xf0]  ;;  %v1363_v54 = vor.u32 %v1675_v47, %v1362_v44 }
  0x1c   :  { %507 = vmatpush.bf16.msra.mxu3 %v1411_v29  ;;  %v1674_v55 = vld [vmem:[#allocation2 + $0x124] sm:$0xf]  ;;  %v1364_v56 = vld [vmem:[#allocation2 + $0x12c] sm:$0xf0]  ;;  %v1350_v57 = vld [vmem:[#allocation2 + $0x108] sm:$0xf]  ;;  %v1255_v59 = vor.u32 %v1648_v50, %v1254_v49  ;;  %v1283_v60 = vor.u32 %v1653_v51, %v1280_v53 }
  0x1d   :  { %527 = vmatpush.bf16.msra.mxu2 %v1391_v36  ;;  %489 = vmatpush.bf16.msra.mxu1 %v1375_v41  ;;  %v1672_v58 = vld [vmem:[#allocation2 + $0x110] sm:$0xf0]  ;;  %v1242_v61 = vld [vmem:[#allocation2 + $0x30] sm:$0xf]  ;;  %v1645_v62 = vld [vmem:[#allocation2 + $0x38] sm:$0xf0]  ;;  %v1367_v0 = vor.u32 %v1674_v55, %v1364_v56 }
  0x1e   :  { %v1650_v63 = vld [vmem:[#allocation2 + $0x64] sm:$0xf]  ;;  %v1268_v1 = vld [vmem:[#allocation2 + $0x6c] sm:$0xf0]  ;;  %v1351_v2 = vor.u32 %v1672_v58, %v1350_v57  ;;  %v1671_v3 = vld [vmem:[#allocation2 + $0x10c] sm:$0xf]  ;;  %v1243_v7 = vor.u32 %v1645_v62, %v1242_v61 }
  0x1f   :  { %1444 = vmatmul.msk.bf16.vlgmr.msra.gmra.mxu3 %vm460_vm1, %v1970_v45  ;;  %477 = vmatpush.bf16.msra.mxu0 %v1267_v46  ;;  %v1352_v4 = vld [vmem:[#allocation2 + $0x114] sm:$0xf0]  ;;  %v1338_v5 = vld [vmem:[#allocation2 + $0xf0] sm:$0xf]  ;;  %v1669_v6 = vld [vmem:[#allocation2 + $0xf8] sm:$0xf0]  ;;  %v1271_v8 = vor.u32 %v1650_v63, %v1268_v1 }
  0x20   :  { %513 = vmatpush.bf16.msrb.mxu3 %v1307_v34  ;;  %v1230_v9 = vld [vmem:[#allocation2 + $0x18] sm:$0xf]  ;;  %v1642_v10 = vld [vmem:[#allocation2 + $0x20] sm:$0xf0]  ;;  %v1647_v11 = vld [vmem:[#allocation2 + $0x4c] sm:$0xf]  ;;  %v1355_v12 = vor.u32 %v1671_v3, %v1352_v4  ;;  %v1339_v14 = vor.u32 %v1669_v6, %v1338_v5 }
  0x21   :  { %528 = vmatpush.bf16.msra.mxu2 %v1379_v52  ;;  %490 = vmatpush.bf16.msra.mxu1 %v1363_v54  ;;  %v1256_v13 = vld [vmem:[#allocation2 + $0x54] sm:$0xf0]  ;;  %v1668_v15 = vld [vmem:[#allocation2 + $0xf4] sm:$0xf]  ;;  %v1340_v16 = vld [vmem:[#allocation2 + $0xfc] sm:$0xf0]  ;;  %v1231_v19 = vor.u32 %v1642_v10, %v1230_v9 }
  0x22   :  { %v1326_v17 = vld [vmem:[#allocation2 + $0xd8] sm:$0xf]  ;;  %v1666_v18 = vld [vmem:[#allocation2 + $0xe0] sm:$0xf0]  ;;  %v1218_v20 = vld [vmem:[#allocation2] sm:$0xf]  ;;  %v1259_v22 = vor.u32 %v1647_v11, %v1256_v13  ;;  %v1343_v25 = vor.u32 %v1668_v15, %v1340_v16 }
  0x23   :  { %478 = vmatpush.bf16.msra.mxu0 %v1255_v59  ;;  %v1692_v21 = vld [vmem:[#allocation2 + $0x1b4] sm:$0xf]  ;;  %v1639_v23 = vld [vmem:[#allocation2 + $0x8] sm:$0xf0]  ;;  %v1436_v26 = vld [vmem:[#allocation2 + $0x1bc] sm:$0x30]  ;;  %v1327_v28 = vor.u32 %v1666_v18, %v1326_v17 }
  0x24   :  { %514 = vmatpush.bf16.msrb.mxu3 %v1295_v48  ;;  %v1644_v24 = vld [vmem:[#allocation2 + $0x34] sm:$0xf]  ;;  %v1244_v27 = vld [vmem:[#allocation2 + $0x3c] sm:$0xf0]  ;;  %v1665_v29 = vld [vmem:[#allocation2 + $0xdc] sm:$0xf]  ;;  %v1439_v33 = vor.u32 %v1692_v21, %v1436_v26  ;;  %v1219_v34 = vor.u32 %v1639_v23, %v1218_v20 }
  0x25   :  { %529 = vmatpush.bf16.msra.mxu2 %v1367_v0  ;;  %491 = vmatpush.bf16.msra.mxu1 %v1351_v2  ;;  %v1328_v30 = vld [vmem:[#allocation2 + $0xe4] sm:$0xf0]  ;;  %v1314_v31 = vld [vmem:[#allocation2 + $0xc0] sm:$0xf]  ;;  %v1663_v32 = vld [vmem:[#allocation2 + $0xc8] sm:$0xf0]  ;;  %v1247_v38 = vor.u32 %v1644_v24, %v1244_v27 }
  0x26   :  { %v77_v35 = vld [vmem:[%s2046_s0] sm:$0xff]  ;;  %v1310_v36 = vld [vmem:[#allocation2 + $0xb0] sm:$0xf]  ;;  %v1661_v37 = vld [vmem:[#allocation2 + $0xb8] sm:$0xf0]  ;;  %v1331_v40 = vor.u32 %v1665_v29, %v1328_v30  ;;  %v1315_v42 = vor.u32 %v1663_v32, %v1314_v31  ;;  %v469_v48 = vsel %vm464_vm0, %v1439_v33, 0 }
  0x27   :  { %479 = vmatpush.bf16.msra.mxu0 %v1243_v7  ;;  %v1641_v39 = vld [vmem:[#allocation2 + $0x1c] sm:$0xf]  ;;  %v1232_v41 = vld [vmem:[#allocation2 + $0x24] sm:$0xf0]  ;;  %v1662_v43 = vld [vmem:[#allocation2 + $0xc4] sm:$0xf]  ;;  %v1977_v46 = vpack.c.bf16 %v77_v35, %v77_v35  ;;  %v1311_v47 = vor.u32 %v1661_v37, %v1310_v36 }
  0x28   :  { %515 = vmatpush.bf16.msrb.mxu3 %v1283_v60  ;;  %v1316_v44 = vld [vmem:[#allocation2 + $0xcc] sm:$0xf0]  ;;  %v78_v49 = vld [vmem:[%s2046_s0 + $0x8] sm:$0xff]  ;;  %v1689_v50 = vld [vmem:[#allocation2 + $0x19c] sm:$0xf]  ;;  %v1235_v55 = vor.u32 %v1641_v39, %v1232_v41  ;;  %s1893_s0 = smov 127  }
  0x29   :  { %530 = vmatpush.bf16.msra.mxu2 %v1355_v12  ;;  %492 = vmatpush.bf16.msra.mxu1 %v1339_v14  ;;  %v1424_v51 = vld [vmem:[#allocation2 + $0x1a4] sm:$0xf0]  ;;  %v1298_v52 = vld [vmem:[#allocation2 + $0x98] sm:$0xf]  ;;  %v1658_v53 = vld [vmem:[#allocation2 + $0xa0] sm:$0xf0]  ;;  %v1319_v58 = vor.u32 %v1662_v43, %v1316_v44  ;;  %v1983_v62 = vpack.c.bf16 %v78_v49, %v78_v49 }
  0x2a   :  { %v1442_v54 = vld [vmem:[#allocation2 + $0x1b8] sm:$0xf]  ;;  %v1638_v56 = vld [vmem:[#allocation2 + $0x4] sm:$0xf]  ;;  %v1220_v57 = vld [vmem:[#allocation2 + $0xc] sm:$0xf0]  ;;  %v1427_v63 = vor.u32 %v1689_v50, %v1424_v51  ;;  %v1299_v2 = vor.u32 %v1658_v53, %v1298_v52 }
  0x2b   :  { %480 = vmatpush.bf16.msra.mxu0 %v1231_v19  ;;  %v1694_v59 = vld [vmem:[#allocation2 + $0x1c0] sm:$0x30]  ;;  %v1406_v60 = vld [vmem:[#allocation2 + $0x170] sm:$0xf]  ;;  %v1685_v61 = vld [vmem:[#allocation2 + $0x178] sm:$0xf0]  ;;  %v1223_v9 = vor.u32 %v1638_v56, %v1220_v57 }
  0x2c   :  { %516 = vmatpush.bf16.msrb.mxu3 %v1271_v8  ;;  %v1286_v0 = vld [vmem:[#allocation2 + $0x80] sm:$0xf]  ;;  %v1443_v1 = vor.u32 %v1694_v59, %v1442_v54  ;;  %v1655_v3 = vld [vmem:[#allocation2 + $0x88] sm:$0xf0]  ;;  %v1686_v4 = vld [vmem:[#allocation2 + $0x184] sm:$0xf]  ;;  %v1407_v10 = vor.u32 %v1685_v61, %v1406_v60 }
  0x2d   :  { %531 = vmatpush.bf16.msra.mxu2 %v1343_v25  ;;  %493 = vmatpush.bf16.msra.mxu1 %v1327_v28  ;;  %v1412_v5 = vld [vmem:[#allocation2 + $0x18c] sm:$0xf0]  ;;  %v1430_v7 = vld [vmem:[#allocation2 + $0x1a0] sm:$0xf]  ;;  %v1691_v8 = vld [vmem:[#allocation2 + $0x1a8] sm:$0xf0]  ;;  %v1287_v14 = vor.u32 %v1655_v3, %v1286_v0 }
  0x2e   :  { %v472_v6 = vsel %vm464_vm0, %v1443_v1, 0  ;;  %v1394_v11 = vld [vmem:[#allocation2 + $0x158] sm:$0xf]  ;;  %v1682_v12 = vld [vmem:[#allocation2 + $0x160] sm:$0xf0]  ;;  %v1415_v13 = vor.u32 %v1686_v4, %v1412_v5  ;;  %v1431_v17 = vor.u32 %v1691_v8, %v1430_v7  ;;  %s1894_s29 = smov 126  }
  0x2f   :  { %481 = vmatpush.bf16.msra.mxu0 %v1219_v34  ;;  %v1274_v15 = vld [vmem:[#allocation2 + $0x68] sm:$0xf]  ;;  %v1652_v16 = vld [vmem:[#allocation2 + $0x70] sm:$0xf0]  ;;  %v1395_v20 = vor.u32 %v1682_v12, %v1394_v11  ;;  %v1382_v21 = vld [vmem:[#allocation2 + $0x140] sm:$0xf] }
  0x30   :  { %517 = vmatpush.bf16.msrb.mxu3 %v1259_v22  ;;  %v1418_v18 = vld [vmem:[#allocation2 + $0x188] sm:$0xf]  ;;  %v1688_v19 = vld [vmem:[#allocation2 + $0x190] sm:$0xf0]  ;;  %v1679_v22 = vld [vmem:[#allocation2 + $0x148] sm:$0xf0]  ;;  %v1275_v23 = vor.u32 %v1652_v16, %v1274_v15 }
  0x31   :  { %532 = vmatpush.bf16.msra.mxu2 %v1331_v40  ;;  %494 = vmatpush.bf16.msra.mxu1 %v1315_v42  ;;  %v1419_v24 = vor.u32 %v1688_v19, %v1418_v18  ;;  %v1262_v25 = vld [vmem:[#allocation2 + $0x50] sm:$0xf]  ;;  %v1649_v26 = vld [vmem:[#allocation2 + $0x58] sm:$0xf0]  ;;  %v1383_v27 = vor.u32 %v1679_v22, %v1382_v21  ;;  %v1370_v28 = vld [vmem:[#allocation2 + $0x128] sm:$0xf] }
  0x32   :  { %482 = vmatmul.bf16.vlgmr.msra.gmra.mxu0 %v1977_v46  ;;  %v1676_v29 = vld [vmem:[#allocation2 + $0x130] sm:$0xf0]  ;;  %v1263_v30 = vor.u32 %v1649_v26, %v1262_v25  ;;  %v1250_v31 = vld [vmem:[#allocation2 + $0x38] sm:$0xf]  ;;  %v1646_v32 = vld [vmem:[#allocation2 + $0x40] sm:$0xf0] }
  0x33   :  { %544 = vmatpush.bf16.msrb.mxu0 %v469_v48  ;;  %v1371_v33 = vor.u32 %v1676_v29, %v1370_v28  ;;  %v1358_v34 = vld [vmem:[#allocation2 + $0x110] sm:$0xf]  ;;  %v1673_v35 = vld [vmem:[#allocation2 + $0x118] sm:$0xf0]  ;;  %v1251_v36 = vor.u32 %v1646_v32, %v1250_v31  ;;  %v1238_v37 = vld [vmem:[#allocation2 + $0x20] sm:$0xf] }
  0x34   :  { %518 = vmatpush.bf16.msrb.mxu3 %v1247_v38  ;;  %495 = vmatmul.bf16.vlgmr.msra.gmra.mxu1 %v1983_v62  ;;  %v1643_v38 = vld [vmem:[#allocation2 + $0x28] sm:$0xf0]  ;;  %v1359_v39 = vor.u32 %v1673_v35, %v1358_v34  ;;  %v1346_v40 = vld [vmem:[#allocation2 + $0xf8] sm:$0xf]  ;;  %v1670_v41 = vld [vmem:[#allocation2 + $0x100] sm:$0xf0] }
  0x35   :  { %552 = vmatpush.bf16.msrb.mxu1 %v1311_v47  ;;  %533 = vmatpush.bf16.msra.mxu2 %v1319_v58  ;;  %v1239_v42 = vor.u32 %v1643_v38, %v1238_v37  ;;  %v1226_v43 = vld [vmem:[#allocation2 + $0x8] sm:$0xf]  ;;  %v1640_v44 = vld [vmem:[#allocation2 + $0x10] sm:$0xf0]  ;;  %v1347_v47 = vor.u32 %v1670_v41, %v1346_v40  ;;  %v1334_v48 = vld [vmem:[#allocation2 + $0xe0] sm:$0xf] }
  0x36   :  { %v1667_v49 = vld [vmem:[#allocation2 + $0xe8] sm:$0xf0]  ;;  %v1227_v50 = vor.u32 %v1640_v44, %v1226_v43  ;;  %v1322_v52 = vld [vmem:[#allocation2 + $0xc8] sm:$0xf]  ;;  %v1664_v53 = vld [vmem:[#allocation2 + $0xd0] sm:$0xf0] }
  0x37   :  { %545 = vmatpush.bf16.msrb.mxu0 %v1427_v63  ;;  %v1335_v51 = vor.u32 %v1667_v49, %v1334_v48  ;;  %v1323_v54 = vor.u32 %v1664_v53, %v1322_v52  ;;  %v1710_v7 = vld [vmem:[#allocation4 + $0x74] sm:$0xf0]  ;;  %v1497_v8 = vld [vmem:[#allocation4 + $0x60] sm:$0xf]  ;;  %v1709_v11 = vld [vmem:[#allocation4 + $0x74] sm:$0xf] }
  0x38   :  { %519 = vmatpush.bf16.msrb.mxu3 %v1235_v55  ;;  %534 = vmatmul.bf16.vlgmr.msra.gmra.mxu2 %v1983_v62  ;;  %v1507_v12 = vld [vmem:[#allocation4 + $0x78] sm:$0xf0]  ;;  %v1707_v15 = vld [vmem:[#allocation4 + $0x64] sm:$0xf]  ;;  %v1489_v18 = vld [vmem:[#allocation4 + $0x50] sm:$0xf] }
  0x39   :  { %553 = vmatpush.bf16.msrb.mxu1 %v1299_v2  ;;  %583 = vmatpush.bf16.msrb.mxu2 %v472_v6  ;;  %v1505_v6 = vld [vmem:[#allocation4 + $0x70] sm:$0xf]  ;;  %v1706_v19 = vld [vmem:[#allocation4 + $0x54] sm:$0xf0]  ;;  %v1705_v21 = vld [vmem:[#allocation4 + $0x54] sm:$0xf] }
  0x3a   :  { %v1491_v22 = vld [vmem:[#allocation4 + $0x58] sm:$0xf0]  ;;  %v1481_v25 = vld [vmem:[#allocation4 + $0x40] sm:$0xf]  ;;  %v1704_v26 = vld [vmem:[#allocation4 + $0x44] sm:$0xf0] }
  0x3b   :  { %546 = vmatpush.bf16.msrb.mxu0 %v1415_v13  ;;  %v1703_v28 = vld [vmem:[#allocation4 + $0x44] sm:$0xf]  ;;  %v1483_v29 = vld [vmem:[#allocation4 + $0x48] sm:$0xf0]  ;;  %v1482_v31 = vor.u32 %v1704_v26, %v1481_v25  ;;  %v1473_v32 = vld [vmem:[#allocation4 + $0x30] sm:$0xf] }
  0x3c   :  { %520 = vmatpush.bf16.msrb.mxu3 %v1223_v9  ;;  %v1506_v9 = vor.u32 %v1710_v7, %v1505_v6  ;;  %v1486_v34 = vor.u32 %v1703_v28, %v1483_v29  ;;  %v1465_v41 = vld [vmem:[#allocation4 + $0x20] sm:$0xf]  ;;  %v1701_v43 = vld [vmem:[#allocation4 + $0x34] sm:$0xf]  ;;  %v1457_v49 = vld [vmem:[#allocation4 + $0x10] sm:$0xf] }
  0x3d   :  { %554 = vmatpush.bf16.msrb.mxu1 %v1287_v14  ;;  %584 = vmatpush.bf16.msrb.mxu2 %v1431_v17  ;;  %v1510_v14 = vor.u32 %v1709_v11, %v1507_v12  ;;  %v1499_v17 = vld [vmem:[#allocation4 + $0x68] sm:$0xf0]  ;;  %vm863_vm2 = vcmask 1044480   ;;  %v1561_v6 = vld [vmem:[#allocation4 + $0xe0] sm:$0xf]  ;;  %v1895_v12 = vmov 65535  }
  0x3e   :  { %v1467_v53 = vld [vmem:[#allocation4 + $0x28] sm:$0xf0]  ;;  %v1724_v7 = vld [vmem:[#allocation4 + $0xe4] sm:$0xf0]  ;;  %vm600_vm3 = vcmask 1039360   ;;  %vm615_vm4 = vcmask 1031168  }
  0x3f   :  { %521 = vmatmul.bf16.vlgmr.msrb.gmra.mxu3 %v1977_v46  ;;  %872 = vmatpush.bf16.msra.mxu0 %v1506_v9  ;;  %v1562_v9 = vor.u32 %v1724_v7, %v1561_v6  ;;  %v1595_v6 = vld [vmem:[#allocation4 + $0x128] sm:$0x30]  ;;  %vm859_vm5 = vcmask 351232   ;;  %vm1056_vm6 = vcmask 1041408   ;;  %vm1057_vm7 = vcmask 1042432  }
  0x40   :  { %565 = vmatpush.bf16.msra.mxu3 %v1407_v10  ;;  %v1708_v10 = vld [vmem:[#allocation4 + $0x64] sm:$0xf0]  ;;  %vm1052_vm8 = vcmask 171008  }
  0x41   :  { %555 = vmatpush.bf16.msrb.mxu1 %v1275_v23  ;;  %585 = vmatpush.bf16.msrb.mxu2 %v1419_v24  ;;  %v1498_v16 = vor.u32 %v1708_v10, %v1497_v8  ;;  %v1490_v24 = vor.u32 %v1706_v19, %v1489_v18  ;;  %v1723_v8 = vld [vmem:[#allocation4 + $0xe4] sm:$0xf]  ;;  %v1563_v10 = vld [vmem:[#allocation4 + $0xe8] sm:$0xf0]  ;;  %v1555_v18 = vld [vmem:[#allocation4 + $0xd8] sm:$0xf0] }
  0x42   :  { %1445 = vmatmul.msk.bf16.vlgmr.msrb.gmra.mxu0 %vm460_vm1, %v1970_v45  ;;  %v1566_v11 = vor.u32 %v1723_v8, %v1563_v10  ;;  %v1545_v19 = vld [vmem:[#allocation4 + $0xc0] sm:$0xf] }
  0x43   :  { %873 = vmatpush.bf16.msra.mxu0 %v1498_v16  ;;  %v1721_v16 = vld [vmem:[#allocation4 + $0xd4] sm:$0xf] }
  0x44   :  { %566 = vmatpush.bf16.msra.mxu3 %v1395_v20  ;;  %v1502_v20 = vor.u32 %v1707_v15, %v1499_v17  ;;  %v1722_v15 = vld [vmem:[#allocation4 + $0xd4] sm:$0xf0] }
  0x45   :  { %556 = vmatpush.bf16.msrb.mxu1 %v1263_v30 }
  0x47   :  { %874 = vmatpush.bf16.msra.mxu0 %v1490_v24  ;;  %v1593_v24 = vld [vmem:[#allocation4 + $0x120] sm:$0xf] }
  0x48   :  { %567 = vmatpush.bf16.msra.mxu3 %v1383_v27  ;;  %1446 = vmatmul.msk.bf16.vlgmr.msrb.gmra.mxu2 %vm460_vm1, %v1970_v45  ;;  %v1494_v27 = vor.u32 %v1705_v21, %v1491_v22  ;;  %v1558_v21 = vor.u32 %v1721_v16, %v1555_v18  ;;  %v1719_v22 = vld [vmem:[#allocation4 + $0xc4] sm:$0xf] }
  0x49   :  { %557 = vmatpush.bf16.msrb.mxu1 %v1251_v36 }
  0x4b   :  { %875 = vmatpush.bf16.msra.mxu0 %v1482_v31  ;;  %v1718_v31 = vld [vmem:[#allocation4 + $0xb4] sm:$0xf0] }
  0x4c   :  { %568 = vmatpush.bf16.msra.mxu3 %v1371_v33  ;;  %v1702_v33 = vld [vmem:[#allocation4 + $0x34] sm:$0xf0] }
  0x4d   :  { %558 = vmatpush.bf16.msrb.mxu1 %v1239_v42  ;;  %v1474_v36 = vor.u32 %v1702_v33, %v1473_v32  ;;  %v1700_v42 = vld [vmem:[#allocation4 + $0x24] sm:$0xf0]  ;;  %v1717_v32 = vld [vmem:[#allocation4 + $0xb4] sm:$0xf]  ;;  %v1539_v33 = vld [vmem:[#allocation4 + $0xb8] sm:$0xf0] }
  0x4e   :  { %v1466_v44 = vor.u32 %v1700_v42, %v1465_v41  ;;  %v1531_v42 = vld [vmem:[#allocation4 + $0xa8] sm:$0xf0] }
  0x4f   :  { %876 = vmatpush.bf16.msra.mxu0 %v1474_v36  ;;  %v1542_v36 = vor.u32 %v1717_v32, %v1539_v33 }
  0x50   :  { %569 = vmatpush.bf16.msra.mxu3 %v1359_v39 }
  0x51   :  { %559 = vmatpush.bf16.msrb.mxu1 %v1227_v50  ;;  %v1698_v50 = vld [vmem:[#allocation4 + $0x14] sm:$0xf0] }
  0x52   :  { %v1458_v52 = vor.u32 %v1698_v50, %v1457_v49  ;;  %v1714_v50 = vld [vmem:[#allocation4 + $0x94] sm:$0xf0] }
  0x53   :  { %877 = vmatpush.bf16.msra.mxu0 %v1466_v44  ;;  %v1730_v44 = vld [vmem:[#allocation4 + $0x114] sm:$0xf0] }
  0x54   :  { %570 = vmatpush.bf16.msra.mxu3 %v1347_v47  ;;  %560 = vmatmul.bf16.vlgmr.msrb.gmra.mxu1 %v1977_v46  ;;  %v1475_v47 = vld [vmem:[#allocation4 + $0x38] sm:$0xf0] }
  0x55   :  { %v1478_v48 = vor.u32 %v1701_v43, %v1475_v47  ;;  %v1585_v43 = vld [vmem:[#allocation4 + $0x110] sm:$0xf] }
  0x56   :  { %v1586_v49 = vor.u32 %v1730_v44, %v1585_v43 }
  0x57   :  { %878 = vmatpush.bf16.msra.mxu0 %v1458_v52  ;;  %v1523_v52 = vld [vmem:[#allocation4 + $0x98] sm:$0xf0] }
  0x58   :  { %571 = vmatpush.bf16.msra.mxu3 %v1335_v51  ;;  %v1699_v51 = vld [vmem:[#allocation4 + $0x24] sm:$0xf] }
  0x5c   :  { %572 = vmatpush.bf16.msra.mxu3 %v1323_v54  ;;  %v1470_v54 = vor.u32 %v1699_v51, %v1467_v53  ;;  %v1713_v51 = vld [vmem:[#allocation4 + $0x94] sm:$0xf] }
  0x5f   :  { %573 = vmatmul.bf16.vlgmr.msra.gmra.mxu3 %v1983_v62 }
  0x60   :  { %911 = vmatpush.bf16.msrb.mxu3 %v1510_v14  ;;  %v1553_v14 = vld [vmem:[#allocation4 + $0xd0] sm:$0xf] }
  0x61   :  { %v1554_v17 = vor.u32 %v1722_v15, %v1553_v14 }
  0x64   :  { %912 = vmatpush.bf16.msrb.mxu3 %v1502_v20  ;;  %v1720_v20 = vld [vmem:[#allocation4 + $0xc4] sm:$0xf0] }
  0x65   :  { %v1546_v26 = vor.u32 %v1720_v20, %v1545_v19  ;;  %v1727_v19 = vld [vmem:[#allocation4 + $0x104] sm:$0xf]  ;;  %v1579_v20 = vld [vmem:[#allocation4 + $0x108] sm:$0xf0] }
  0x68   :  { %913 = vmatpush.bf16.msrb.mxu3 %v1494_v27  ;;  %v1732_v27 = vld [vmem:[#allocation4 + $0x124] sm:$0x30] }
  0x69   :  { %v1594_v29 = vor.u32 %v1732_v27, %v1593_v24 }
  0x6c   :  { %914 = vmatpush.bf16.msrb.mxu3 %v1486_v34 }
  0x70   :  { %915 = vmatpush.bf16.msrb.mxu3 %v1478_v48  ;;  %v1521_v48 = vld [vmem:[#allocation4 + $0x90] sm:$0xf] }
  0x71   :  { %v1522_v53 = vor.u32 %v1714_v50, %v1521_v48 }
  0x74   :  { %916 = vmatpush.bf16.msrb.mxu3 %v1470_v54  ;;  %v1526_v54 = vor.u32 %v1713_v51, %v1523_v52 }
  0xa2   :  { %v509_v45 = vpop.f32.mrf.mxu3 }
  0xaa   :  { %v511_v55 = vpop.f32.mrf.mxu3 }
  0xab   :  { %v1696_v55 = vld [vmem:[#allocation4 + $0x4] sm:$0xf0] }
  0xaf   :  { %v483_v56 = vpop.f32.mrf.mxu0 }
  0xb1   :  { %v496_v57 = vpop.f32.mrf.mxu1 }
  0xb2   :  { %v497_v61 = vadd.f32 %v496_v57, %v483_v56  ;;  %v1697_v56 = vld [vmem:[#allocation4 + $0x14] sm:$0xf] }
  0xb4   :  { %v1996_v2 = vadd.f32 %v509_v45, %v497_v61  ;;  %v1449_v45 = vld [vmem:[#allocation4] sm:$0xf] }
  0xb5   :  { %v1450_v57 = vor.u32 %v1696_v55, %v1449_v45  ;;  %v1577_v45 = vld [vmem:[#allocation4 + $0x100] sm:$0xf]  ;;  %v1728_v55 = vld [vmem:[#allocation4 + $0x104] sm:$0xf0] }
  0xb7   :  { %v485_v58 = vpop.f32.mrf.mxu0  ;;  %879 = vmatpush.bf16.msra.mxu0 %v1450_v57  ;;  %v1578_v57 = vor.u32 %v1728_v55, %v1577_v45 }
  0xb8   :  { %v1459_v58 = vld [vmem:[#allocation4 + $0x18] sm:$0xf0] }
  0xb9   :  { %v498_v60 = vpop.f32.mrf.mxu1  ;;  %v1462_v61 = vor.u32 %v1697_v56, %v1459_v58 }
  0xba   :  { %v1726_v60 = vld [vmem:[#allocation4 + $0xf4] sm:$0xf0] }
  0xbb   :  { %v535_v59 = vpop.f32.mrf.mxu2  ;;  %917 = vmatpush.bf16.msrb.mxu3 %v1462_v61  ;;  %v1712_v61 = vld [vmem:[#allocation4 + $0x84] sm:$0xf0] }
  0xbf   :  { %v548_v1 = vpop.f32.mrf.mxu0 }
  0xc2   :  { %v522_v63 = vpop.f32.mrf.mxu3 }
  0xc3   :  { %v536_v0 = vadd.f32 %v535_v59, %v522_v63  ;;  %v537_v4 = vpop.f32.mrf.mxu2  ;;  %v1569_v59 = vld [vmem:[#allocation4 + $0xf0] sm:$0xf] }
  0xc4   :  { %v1570_v63 = vor.u32 %v1726_v60, %v1569_v59  ;;  %v1513_v60 = vld [vmem:[#allocation4 + $0x80] sm:$0xf] }
  0xc5   :  { %v1998_v3 = vadd.f32 %v548_v1, %v536_v0  ;;  %v1725_v0 = vld [vmem:[#allocation4 + $0xf4] sm:$0xf]  ;;  %v1571_v1 = vld [vmem:[#allocation4 + $0xf8] sm:$0xf0] }
  0xc6   :  { %v1574_v4 = vor.u32 %v1725_v0, %v1571_v1  ;;  %885 = vmatpush.bf16.msra.mxu2 %v1570_v63  ;;  %v1711_v63 = vld [vmem:[#allocation4 + $0x84] sm:$0xf]  ;;  %v1514_v0 = vor.u32 %v1712_v61, %v1513_v60  ;;  %v1515_v1 = vld [vmem:[#allocation4 + $0x88] sm:$0xf0] }
  0xc7   :  { %v1770_v46 = vpack.i.bf16 %v1998_v3, %v1996_v2  ;;  %v550_v5 = vpop.f32.mrf.mxu0  ;;  %v1735_v60 = vld [vmem:[#allocation6 + $0x10] sm:$0xff] }
  0xc8   :  { %924 = vmatpush.bf16.msrb.mxu0 %v1574_v4  ;;  %v1518_v4 = vor.u32 %v1711_v63, %v1515_v1  ;;  %v1058_v63 = vsel %vm1056_vm6, 4294967295, %v1895_v12 }
  0xc9   :  { %1771 = vrot.lane.b32.xlu0 %v1770_v46, %s1893_s0 }
  0xca   :  { %v524_v62 = vpop.f32.mrf.mxu3  ;;  %886 = vmatpush.bf16.msra.mxu2 %v1562_v9 }
  0xcb   :  { %v587_v13 = vpop.f32.mrf.mxu2  ;;  %v1451_v62 = vld [vmem:[#allocation4 + $0x8] sm:$0xf0] }
  0xcc   :  { %925 = vmatpush.bf16.msrb.mxu0 %v1566_v11  ;;  %v1729_v11 = vld [vmem:[#allocation4 + $0x114] sm:$0xf] }
  0xce   :  { %887 = vmatpush.bf16.msra.mxu2 %v1554_v17 }
  0xd0   :  { %926 = vmatpush.bf16.msrb.mxu0 %v1558_v21  ;;  %v1582_v21 = vor.u32 %v1727_v19, %v1579_v20  ;;  %v1896_v19 = vmov 2   ;;  %v1897_v20 = vmov 1  }
  0xd1   :  { %1776 = vrot.lane.b32.xlu0 %v1770_v46, %s1894_s29  ;;  %v561_v23 = vpop.f32.mrf.mxu1  ;;  %v1695_v46 = vld [vmem:[#allocation4 + $0x4] sm:$0xf]  ;;  %1792 = vset.pattern.permute.xlu2 %v1896_v19 }
  0xd2   :  { %v1454_v5 = vor.u32 %v1695_v46, %v1451_v62  ;;  %888 = vmatpush.bf16.msra.mxu2 %v1546_v26  ;;  %1791 = vset.pattern.permute.xlu1 %v1897_v20 }
  0xd3   :  { %v589_v30 = vpop.f32.mrf.mxu2 }
  0xd4   :  { %918 = vmatpush.bf16.msrb.mxu3 %v1454_v5  ;;  %v1537_v30 = vld [vmem:[#allocation4 + $0xb0] sm:$0xf]  ;;  %v1731_v5 = vld [vmem:[#allocation4 + $0x124] sm:$0xf] }
  0xd5   :  { %v1598_v9 = vor.u32 %v1731_v5, %v1595_v6 }
  0xd9   :  { %v563_v35 = vpop.f32.mrf.mxu1 }
  0xda   :  { %v1538_v35 = vor.u32 %v1718_v31, %v1537_v30 }
  0xdc   :  { %889 = vmatpush.bf16.msra.mxu2 %v1538_v35  ;;  %v1740_v35 = vld [vmem:[#allocation6 + $0x38] sm:$0xff] }
  0xe2   :  { %v574_v37 = vpop.f32.mrf.mxu3 }
  0xe3   :  { %v575_v38 = vadd.f32 %v574_v37, %v561_v23  ;;  %v1547_v23 = vld [vmem:[#allocation4 + $0xc8] sm:$0xf0]  ;;  %v1529_v37 = vld [vmem:[#allocation4 + $0xa0] sm:$0xf] }
  0xe4   :  { %v1550_v28 = vor.u32 %v1719_v22, %v1547_v23 }
  0xe5   :  { %v2004_v39 = vadd.f32 %v587_v13, %v575_v38  ;;  %v864_v13 = vsel %vm863_vm2, 4294967295, %v1895_v12  ;;  %v1716_v38 = vld [vmem:[#allocation4 + $0xa4] sm:$0xf0] }
  0xe6   :  { %v2012_v25 = vsel %vm464_vm0, %v864_v13, 0  ;;  %927 = vmatpush.bf16.msrb.mxu0 %v1550_v28  ;;  %v1530_v41 = vor.u32 %v1716_v38, %v1529_v37  ;;  %v1587_v13 = vld [vmem:[#allocation4 + $0x118] sm:$0xf0]  ;;  %v665_v38 = vld [vmem:[%s2049_s3] sm:$0x3] }
  0xe7   :  { %598 = vrot.lane.b32.xlu1 %v2004_v39, %s1893_s0  ;;  %v867_v34 = vand.u32 %v1594_v29, %v2012_v25  ;;  %v870_v15 = vand.u32 %v1598_v9, %v2012_v25  ;;  %v1590_v17 = vor.u32 %v1729_v11, %v1587_v13  ;;  %v1738_v37 = vld [vmem:[#allocation6 + $0x28] sm:$0xff]  ;;  %v668_v44 = vperm.slane %v665_v38, 1 }
  0xe8   :  { %890 = vmatpush.bf16.msra.mxu2 %v1530_v41 }
  0xe9   :  { %903 = vmatpush.bf16.msra.mxu1 %v867_v34 }
  0xea   :  { %v576_v40 = vpop.f32.mrf.mxu3  ;;  %928 = vmatpush.bf16.msrb.mxu0 %v1542_v36 }
  0xeb   :  { %v1715_v40 = vld [vmem:[#allocation4 + $0xa4] sm:$0xf] }
  0xec   :  { %v1534_v47 = vor.u32 %v1715_v40, %v1531_v42  ;;  %891 = vmatpush.bf16.msra.mxu2 %v1522_v53  ;;  %v667_v40 = vperm.slane %v665_v38, 0  ;;  %v1737_v42 = vld [vmem:[#allocation6 + $0x20] sm:$0xff]  ;;  %v1910_v38 = vmov 14  }
  0xed   :  { %904 = vmatpush.bf16.msra.mxu1 %v1586_v49 }
  0xee   :  { %929 = vmatpush.bf16.msrb.mxu0 %v1534_v47 }
  0xef   :  { %613 = vrot.lane.b32.xlu1 %v2004_v39, %s1894_s29 }
  0xf0   :  { %892 = vmatpush.bf16.msra.mxu2 %v1514_v0  ;;  %v1059_v0 = vsel %vm1057_vm7, %v1058_v63, 0 }
  0xf1   :  { %905 = vmatpush.bf16.msra.mxu1 %v1578_v57  ;;  %v1736_v57 = vld [vmem:[#allocation6 + $0x18] sm:$0xff] }
  0xf2   :  { %930 = vmatpush.bf16.msrb.mxu0 %v1526_v54 }
  0xf4   :  { %1063 = vmatpush.bf16.msrb.mxu2 %v1740_v35  ;;  %v1905_v35 = vmov 9  }
  0xf5   :  { %942 = vmatpush.bf16.msrb.mxu1 %v870_v15 }
  0xf6   :  { %931 = vmatpush.bf16.msrb.mxu0 %v1518_v4  ;;  %v1734_v4 = vld [vmem:[#allocation6 + $0x8] sm:$0xff] }
  0xf9   :  { %943 = vmatpush.bf16.msrb.mxu1 %v1590_v17 }
  0xfd   :  { %944 = vmatpush.bf16.msrb.mxu1 %v1582_v21  ;;  %v1898_v21 = vmov 0  }
  0xfe   :  { %1790 = vset.pattern.permute.xlu0 %v1898_v21 }
 0x13b   :  { %v1772_v56 = vpop.permute.xlu0 %1771 }
 0x13c   :  { %v1774_v58 = vunpack.i.h.bf16 %v1772_v56  ;;  %v1773_v59 = vunpack.i.l.bf16 %v1772_v56 }
 0x13e   :  { %v601_v46 = vsel %vm600_vm3, %v1773_v59, %v1774_v58 }
 0x13f   :  { %v606_v10 = vmax.f32 %v1996_v2, %v601_v46  ;;  %v1741_v46 = vld [vmem:[#allocation6 + $0x40] sm:$0xff] }
 0x143   :  { %v1777_v62 = vpop.permute.xlu0 %1776 }
 0x144   :  { %v1779_v7 = vunpack.i.h.bf16 %v1777_v62  ;;  %v1778_v8 = vunpack.i.l.bf16 %v1777_v62  ;;  %v1733_v62 = vld [vmem:[#allocation6] sm:$0xff] }
 0x146   :  { %v616_v14 = vsel %vm615_vm4, %v1778_v8, %v1779_v7 }
 0x147   :  { %v621_v16 = vmax.f32 %v606_v10, %v616_v14 }
 0x149   :  { %v624_v18 = vpack.c.bf16 %v621_v16, %v621_v16 }
 0x14b   :  { %880 = vmatmul.bf16.vlgmr.msra.gmra.mxu0 %v624_v18  ;;  %919 = vmatmul.bf16.vlgmr.msrb.gmra.mxu3 %v624_v18 }
 0x159   :  { %v599_v22 = vpop.permute.xlu1 %598 }
 0x15a   :  { %v602_v2 = vsel %vm600_vm3, %v1774_v58, %v599_v22  ;;  %v608_v23 = vmax.f32 %v2004_v39, %v599_v22  ;;  %v1739_v39 = vld [vmem:[#allocation6 + $0x30] sm:$0xff]  ;;  %v990_v58 = vld [vmem:[#allocation6 + $0x48] sm:$0x7] }
 0x15b   :  { %v607_v24 = vmax.f32 %v1998_v3, %v602_v2  ;;  %1064 = vmatpush.bf16.msrb.mxu2 %v1739_v39  ;;  %v1032_v59 = vunpack.c.l.b16 %v990_v58  ;;  %v1806_v2 = vld [vmem:[%s2051_s5] ss:$0 sm:$0xff]  ;;  %v1906_v39 = vmov 8  }
 0x15d   :  { %v1042_v61 = vpack.c.b16 %v1032_v59, %v1032_v59 }
 0x15f   :  { %1065 = vmatpush.bf16.msrb.mxu2 %v1738_v37  ;;  %v1061_v1 = vand.u32 %v1059_v0, %v1042_v61  ;;  %v1909_v37 = vmov 11  }
 0x161   :  { %v614_v26 = vpop.permute.xlu1 %613 }
 0x162   :  { %v617_v25 = vsel %vm615_vm4, %v1779_v7, %v614_v26  ;;  %v623_v27 = vmax.f32 %v608_v23, %v614_v26 }
 0x163   :  { %v622_v28 = vmax.f32 %v607_v24, %v617_v25  ;;  %1066 = vmatpush.bf16.msrb.mxu2 %v1737_v42  ;;  %v1090_v42 = vld [vmem:[%s2052_s6] sm:$0xff] }
 0x164   :  { %v626_v29 = vpack.c.bf16 %v623_v27, %v623_v27  ;;  %v1129_v59 = vperm.slane %v1090_v42, 4 }
 0x165   :  { %v625_v30 = vpack.c.bf16 %v622_v28, %v622_v28 }
 0x166   :  { %1599 = vmatmul.msk.bf16.vlgmr.msra.gmra.mxu1 %vm859_vm5, %v626_v29 }
 0x167   :  { %893 = vmatmul.bf16.vlgmr.msra.gmra.mxu2 %v625_v30  ;;  %932 = vmatmul.bf16.vlgmr.msrb.gmra.mxu0 %v625_v30  ;;  %v1900_v30 = vmov 3  }
 0x168   :  { %1067 = vmatpush.bf16.msrb.mxu2 %v1736_v57  ;;  %1082 = vmatpush.bf16.msra.mxu1 %v1061_v1 }
 0x16c   :  { %1068 = vmatpush.bf16.msrb.mxu2 %v1735_v60  ;;  %1083 = vmatpush.bf16.msra.mxu1 %v1741_v46  ;;  %v1143_v46 = vperm.slane %v1090_v42, 6 }
 0x170   :  { %1069 = vmatpush.bf16.msrb.mxu2 %v1734_v4  ;;  %v1136_v4 = vperm.slane %v1090_v42, 5 }
 0x174   :  { %1070 = vmatpush.bf16.msrb.mxu2 %v1733_v62 }
 0x176   :  { %1600 = vmatmul.msk.bf16.vlgmr.msrb.gmra.mxu1 %vm859_vm5, %v626_v29  ;;  %v1899_v29 = vmov 4  }
 0x1c8   :  { %v881_v31 = vpop.f32.mrf.mxu0 }
 0x1c9   :  { %v882_v48 = vadd.f32 %v881_v31, %v667_v40  ;;  %v1901_v31 = vmov 5   ;;  %v1911_v40 = vmov 13  }
 0x1ce   :  { %v920_v32 = vpop.f32.mrf.mxu3 }
 0x1cf   :  { %v921_v49 = vadd.f32 %v920_v32, %v668_v44  ;;  %v1902_v32 = vmov 7   ;;  %v1101_v44 = vperm.slane %v1090_v42, 0 }
 0x1d0   :  { %v883_v33 = vpop.f32.mrf.mxu0 }
 0x1d1   :  { %v1903_v33 = vmov 6  }
 0x1d6   :  { %v922_v34 = vpop.f32.mrf.mxu3 }
 0x1d7   :  { %v1904_v34 = vmov 10  }
 0x1e3   :  { %v907_v3 = vpop.f32.mrf.mxu1 }
 0x1e4   :  { %v933_v36 = vpop.f32.mrf.mxu0 }
 0x1e5   :  { %v934_v51 = vadd.f32 %v933_v36, %v921_v49  ;;  %v1908_v36 = vmov 12  }
 0x1ea   :  { %v894_v41 = vpop.f32.mrf.mxu2 }
 0x1eb   :  { %v909_v43 = vpop.f32.mrf.mxu1  ;;  %v895_v50 = vadd.f32 %v894_v41, %v882_v48  ;;  %v1807_v48 = vld [vmem:[%s2053_s7] ss:$0 sm:$0xff] }
 0x1ec   :  { %v935_v47 = vpop.f32.mrf.mxu0 }
 0x1ed   :  { %v908_v54 = vadd.f32 %v907_v3, %v895_v50  ;;  %v1907_v3 = vmov 15   ;;  %v1108_v50 = vperm.slane %v1090_v42, 1 }
 0x1f2   :  { %v896_v52 = vpop.f32.mrf.mxu2 }
 0x1f3   :  { %v946_v53 = vpop.f32.mrf.mxu1 }
 0x1f4   :  { %v947_v45 = vadd.f32 %v946_v53, %v934_v51  ;;  %v1115_v53 = vperm.slane %v1090_v42, 2 }
 0x1f6   :  { %v1780_v55 = vpack.i.bf16 %v947_v45, %v908_v54 }
 0x1f8   :  { %1781 = vrot.lane.b32.xlu2 %v1780_v55, %s1893_s0 }
 0x1fb   :  { %v948_v56 = vpop.f32.mrf.mxu1 }
 0x200   :  { %1786 = vrot.lane.b32.xlu2 %v1780_v55, %s1894_s29 }
 0x252   :  { %v1782_v5 = vpop.permute.xlu2 %1781 }
 0x253   :  { %v1784_v6 = vunpack.i.h.bf16 %v1782_v5  ;;  %v1783_v7 = vunpack.i.l.bf16 %v1782_v5 }
 0x255   :  { %v956_v8 = vsel %vm600_vm3, %v1783_v7, %v1784_v6  ;;  %v960_v10 = vmax.f32 %v947_v45, %v1784_v6  ;;  %v1122_v45 = vperm.slane %v1090_v42, 3 }
 0x256   :  { %v959_v12 = vmax.f32 %v908_v54, %v956_v8  ;;  %v1091_v8 = vld [vmem:[%s2052_s6 + $0x8] sm:$0xff] }
 0x257   :  { %v1171_v21 = vperm.slane %v1091_v8, 2 }
 0x25a   :  { %v1787_v9 = vpop.permute.xlu2 %1786 }
 0x25b   :  { %v1789_v11 = vunpack.i.h.bf16 %v1787_v9  ;;  %v1788_v13 = vunpack.i.l.bf16 %v1787_v9  ;;  %v1150_v9 = vperm.slane %v1090_v42, 7 }
 0x25d   :  { %v965_v14 = vsel %vm615_vm4, %v1788_v13, %v1789_v11  ;;  %v969_v15 = vmax.f32 %v960_v10, %v1789_v11  ;;  %v1157_v11 = vperm.slane %v1091_v8, 0 }
 0x25e   :  { %v968_v16 = vmax.f32 %v959_v12, %v965_v14 }
 0x25f   :  { %v971_v17 = vpack.c.bf16 %v969_v15, %v969_v15 }
 0x260   :  { %v970_v18 = vpack.c.bf16 %v968_v16, %v968_v16 }
 0x261   :  { %1637 = vmatmul.msk.bf16.vlgmr.msra.gmra.mxu1 %vm1052_vm8, %v971_v17  ;;  %v1164_v17 = vperm.slane %v1091_v8, 1 }
 0x262   :  { %1071 = vmatmul.bf16.vlgmr.msrb.gmra.mxu2 %v970_v18 }
 0x2de   :  { %v1085_v22 = vpop.f32.mrf.mxu1 }
 0x2e5   :  { %v1072_v23 = vpop.f32.mrf.mxu2 }
 0x2e6   :  { %v1073_v24 = vadd.f32 %v1806_v2, %v1072_v23  ;;  %v1087_v26 = vpop.f32.mrf.mxu1 }
 0x2e8   :  { %v1086_v25 = vadd.f32 %v1085_v22, %v1073_v24  ;;  %v1178_v22 = vperm.slane %v1091_v8, 3 }
 0x2ea   :  { %v1089_v27 = vmax.f32 %v1086_v25, 0.0 }
 0x2ec   :  { %1112 = vperm.xlu2 %1792, %v1089_v27   ;;  %1105 = vperm.xlu1 %1791, %v1089_v27  }
 0x2ed   :  { %1098 = vperm.xlu0 %1790, %v1089_v27   ;;  %v1074_v28 = vpop.f32.mrf.mxu2 }
 0x2ee   :  { %v1185_v28 = vperm.slane %v1091_v8, 4 }
 0x2f4   :  { %1794 = vset.pattern.permute.xlu2 %v1899_v29  ;;  %1793 = vset.pattern.permute.xlu1 %v1900_v30 }
 0x2f5   :  { %1795 = vset.pattern.permute.xlu0 %v1901_v31  ;;  %1126 = vperm.xlu2 %1794, %v1089_v27   ;;  %v1192_v31 = vperm.slane %v1091_v8, 5 }
 0x2f6   :  { %1119 = vperm.xlu1 %1793, %v1089_v27   ;;  %1133 = vperm.xlu0 %1795, %v1089_v27  }
 0x2fd   :  { %1797 = vset.pattern.permute.xlu2 %v1902_v32 }
 0x2fe   :  { %1796 = vset.pattern.permute.xlu1 %v1903_v33  ;;  %1800 = vset.pattern.permute.xlu0 %v1904_v34  ;;  %v1199_v33 = vperm.slane %v1091_v8, 6 }
 0x2ff   :  { %1147 = vperm.xlu2 %1797, %v1089_v27   ;;  %1140 = vperm.xlu1 %1796, %v1089_v27  }
 0x300   :  { %1168 = vperm.xlu0 %1800, %v1089_v27  }
 0x307   :  { %1799 = vset.pattern.permute.xlu2 %v1905_v35  ;;  %1798 = vset.pattern.permute.xlu1 %v1906_v39  ;;  %v1206_v39 = vperm.slane %v1091_v8, 7 }
 0x308   :  { %1805 = vset.pattern.permute.xlu0 %v1907_v3  ;;  %1161 = vperm.xlu2 %1799, %v1089_v27  }
 0x309   :  { %1154 = vperm.xlu1 %1798, %v1089_v27   ;;  %1203 = vperm.xlu0 %1805, %v1089_v27  }
 0x310   :  { %1802 = vset.pattern.permute.xlu2 %v1908_v36 }
 0x311   :  { %1801 = vset.pattern.permute.xlu1 %v1909_v37  ;;  %1182 = vperm.xlu2 %1802, %v1089_v27  }
 0x312   :  { %1175 = vperm.xlu1 %1801, %v1089_v27  }
 0x319   :  { %1804 = vset.pattern.permute.xlu2 %v1910_v38 }
 0x31a   :  { %1803 = vset.pattern.permute.xlu1 %v1911_v40  ;;  %1196 = vperm.xlu2 %1804, %v1089_v27  }
 0x31b   :  { %1189 = vperm.xlu1 %1803, %v1089_v27  }
 0x346   :  { %v1113_v41 = vpop.permute.xlu2 %1112 }
 0x347   :  { %v1116_v57 = vmul.f32 %v1115_v53, %v1113_v41 }
 0x34f   :  { %v1127_v51 = vpop.permute.xlu2 %1126 }
 0x350   :  { %v1130_v1 = vmul.f32 %v1129_v59, %v1127_v51 }
 0x359   :  { %v1148_v61 = vpop.permute.xlu2 %1147 }
 0x35a   :  { %v1151_v15 = vmul.f32 %v1150_v9, %v1148_v61 }
 0x35e   :  { %v1106_v43 = vpop.permute.xlu1 %1105 }
 0x35f   :  { %v1099_v47 = vpop.permute.xlu0 %1098  ;;  %v1109_v54 = vmul.f32 %v1108_v50, %v1106_v43 }
 0x360   :  { %v1102_v49 = vmul.f32 %v1101_v44, %v1099_v47 }
 0x362   :  { %v1103_v52 = vadd.f32 %v1807_v48, %v1102_v49  ;;  %v1162_v13 = vpop.permute.xlu2 %1161 }
 0x363   :  { %v1165_v20 = vmul.f32 %v1164_v17, %v1162_v13 }
 0x364   :  { %v1110_v56 = vadd.f32 %v1109_v54, %v1103_v52 }
 0x366   :  { %v1117_v60 = vadd.f32 %v1116_v57, %v1110_v56 }
 0x368   :  { %v1120_v55 = vpop.permute.xlu1 %1119  ;;  %v1134_v62 = vpop.permute.xlu0 %1133 }
 0x369   :  { %v1123_v58 = vmul.f32 %v1122_v45, %v1120_v55  ;;  %v1137_v6 = vmul.f32 %v1136_v4, %v1134_v62 }
 0x36b   :  { %v1124_v63 = vadd.f32 %v1123_v58, %v1117_v60  ;;  %v1183_v2 = vpop.permute.xlu2 %1182 }
 0x36c   :  { %v1186_v32 = vmul.f32 %v1185_v28, %v1183_v2 }
 0x36d   :  { %v1131_v5 = vadd.f32 %v1130_v1, %v1124_v63 }
 0x36f   :  { %v1138_v10 = vadd.f32 %v1137_v6, %v1131_v5 }
 0x371   :  { %v1141_v0 = vpop.permute.xlu1 %1140 }
 0x372   :  { %v1144_v7 = vmul.f32 %v1143_v46, %v1141_v0  ;;  %v1169_v23 = vpop.permute.xlu0 %1168 }
 0x373   :  { %v1172_v25 = vmul.f32 %v1171_v21, %v1169_v23 }
 0x374   :  { %v1145_v12 = vadd.f32 %v1144_v7, %v1138_v10  ;;  %v1197_v34 = vpop.permute.xlu2 %1196 }
 0x375   :  { %v1200_v38 = vmul.f32 %v1199_v33, %v1197_v34 }
 0x376   :  { %v1152_v18 = vadd.f32 %v1151_v15, %v1145_v12 }
 0x37b   :  { %v1155_v14 = vpop.permute.xlu1 %1154  ;;  %v1204_v37 = vpop.permute.xlu0 %1203 }
 0x37c   :  { %v1158_v16 = vmul.f32 %v1157_v11, %v1155_v14  ;;  %v1207_v41 = vmul.f32 %v1206_v39, %v1204_v37 }
 0x37e   :  { %v1159_v19 = vadd.f32 %v1158_v16, %v1152_v18 }
 0x380   :  { %v1166_v24 = vadd.f32 %v1165_v20, %v1159_v19 }
 0x382   :  { %v1173_v29 = vadd.f32 %v1172_v25, %v1166_v24 }
 0x384   :  { %v1176_v26 = vpop.permute.xlu1 %1175 }
 0x385   :  { %v1179_v27 = vmul.f32 %v1178_v22, %v1176_v26 }
 0x387   :  { %v1180_v30 = vadd.f32 %v1179_v27, %v1173_v29 }
 0x389   :  { %v1187_v3 = vadd.f32 %v1186_v32, %v1180_v30 }
 0x38d   :  { %v1190_v35 = vpop.permute.xlu1 %1189 }
 0x38e   :  { %v1193_v36 = vmul.f32 %v1192_v31, %v1190_v35 }
 0x390   :  { %v1194_v40 = vadd.f32 %v1193_v36, %v1187_v3 }
 0x392   :  { %v1201_v42 = vadd.f32 %v1200_v38, %v1194_v40 }
 0x394   :  { %v1208_v43 = vadd.f32 %v1207_v41, %v1201_v42 }
 0x396   :  { %1209 = vst [vmem:[%s2054_s8] sm:$0xff] %v1208_v43 }
 0x397   :  { %1214 = vsyncpa [#allocation3], 1 }
 0x398   :  { %1215 = vsyncpa [#allocation5], 1 }

</bundles_post_ra>
